<compile_context>
chip_gen: v5e
topology: v5e:2x2
jax: 0.10.0
libtpu: 0.0.40
codegen_flags: <defaults>
</compile_context>

<pallas_src>
import jax
import jax.numpy as jnp
from jax.experimental import pallas as pl
from jax.experimental.pallas import tpu as pltpu


_VMEM_BUDGET_BYTES = 40 * 1024 * 1024   # headroom under v7x's 64 MiB / TensorCore
_MAX_BLOCK_B = 1024                     # ~85% of HBM roofline per measured tiling data


def _round_up(x: int, m: int) -> int:
    return ((x + m - 1) // m) * m


def _vmem_estimate_bytes(tb, obs_dim, hidden, w_itemsize):
    """Rough VMEM footprint: double-buffered pipeline copies + f32 activations."""
    weights = (obs_dim * hidden + hidden * hidden) * w_itemsize + 3 * hidden * 4
    io = tb * obs_dim * 4 + tb * 4                  # state tile + output row
    acts = tb * (obs_dim + 2 * hidden) * 4          # x, h1, h2 live values
    return 2 * (weights + io) + acts


def _choose_block_b(B, obs_dim, hidden, w_itemsize, block_b):
    """Pick a batch tile: multiple of 8 (or full B), VMEM-budgeted, >=2 steps if possible."""
    if block_b is None:
        if B <= 8:
            tb = B
        else:
            n_blocks = max(2, -(-B // _MAX_BLOCK_B))     # >=2 steps -> both v7x TCs
            tb = min(_round_up(-(-B // n_blocks), 8), _MAX_BLOCK_B)
    else:
        tb = max(1, min(int(block_b), B))
        if tb < B:
            tb = _round_up(tb, 8)                        # (8,128) sublane constraint
            if tb >= B:
                tb = B
    # Shrink until the (double-buffered) working set fits the VMEM budget.
    while tb > 8 and _vmem_estimate_bytes(tb, obs_dim, hidden, w_itemsize) > _VMEM_BUDGET_BYTES:
        tb = max(8, _round_up(tb // 2, 8))
    return tb


def _critic_mlp_kernel(s_ref, w1_ref, b1_ref, w2_ref, b2_ref, w3_ref, b3_ref,
                       out_ref):
    """Q1(state) for one batch tile, entirely in VMEM.

    Matmuls run on the MXU in the weights' dtype (bf16 by default) with f32
    accumulation; bias add / ReLU stay in f32 on the VPU.  The final width-1
    layer is a VPU multiply + lane reduction (XLU) rather than an MXU pass.
    """
    x = s_ref[...]                                                    # (tb, obs) f32
    h1 = jnp.dot(x.astype(w1_ref.dtype), w1_ref[...],
                 preferred_element_type=jnp.float32)
    h1 = jnp.maximum(h1 + b1_ref[...], 0.0)                           # (tb, H) f32
    h2 = jnp.dot(h1.astype(w2_ref.dtype), w2_ref[...],
                 preferred_element_type=jnp.float32)
    h2 = jnp.maximum(h2 + b2_ref[...], 0.0)                           # (tb, H) f32
    q = jnp.sum(h2 * w3_ref[...], axis=-1) + b3_ref[0]                # (tb,)  f32
    # Lane-dense store: the batch tile sits on the lane axis of the output slab.
    out_ref[...] = q.reshape(1, 1, -1).astype(out_ref.dtype)          # (1, 1, tb)


def base_critic_forward(state, params, *, block_b=None):
    """Pallas forward pass: q1 = Q1(state).

    state : (B, obs_dim) float32
    params: w1 (obs_dim,H) [bf16/f32], b1 (1,H) f32, w2 (H,H) [bf16/f32],
            b2 (1,H) f32, w3 (1,H) f32, b3 (1,) f32
    Returns (B, 1) float32, matching BaseCritic.forward / Q1(state).
    """
    w1, b1 = params["w1"], params["b1"]
    w2, b2 = params["w2"], params["b2"]
    w3, b3 = params["w3"], params["b3"]

    B, obs_dim = state.shape
    H = w1.shape[1]
    w_itemsize = w1.dtype.itemsize

    tb = _choose_block_b(B, obs_dim, H, w_itemsize, block_b)
    num_blocks = pl.cdiv(B, tb)
    vmem_limit = int(min(max(2 * _vmem_estimate_bytes(tb, obs_dim, H, w_itemsize),
                             16 * 1024 * 1024),
                         48 * 1024 * 1024))

    # NOTE: when tb does not divide B, the last state tile reads padded/undefined
    # rows.  Rows are independent (no cross-row reduction), and the padded output
    # entries are sliced off below, so the result stays correct.
    # NOTE: for best MXU lane occupancy configure obs_dim / H as multiples of 128;
    # the kernel is correct (just masked) for smaller widths.
    out_slab = pl.pallas_call(
        _critic_mlp_kernel,
        out_shape=jax.ShapeDtypeStruct((num_blocks, 1, tb), jnp.float32),
        grid_spec=pltpu.PrefetchScalarGridSpec(
            num_scalar_prefetch=0,
            grid=(num_blocks,),
            in_specs=[
                pl.BlockSpec((tb, obs_dim), lambda i: (i, 0)),       # state tile
                pl.BlockSpec((obs_dim, H), lambda i: (0, 0)),        # w1 (VMEM-resident)
                pl.BlockSpec((1, H), lambda i: (0, 0)),              # b1
                pl.BlockSpec((H, H), lambda i: (0, 0)),              # w2 (VMEM-resident)
                pl.BlockSpec((1, H), lambda i: (0, 0)),              # b2
                pl.BlockSpec((1, H), lambda i: (0, 0)),              # w3 row
                pl.BlockSpec(memory_space=pltpu.MemorySpace.SMEM),   # b3 scalar
            ],
            out_specs=pl.BlockSpec((1, 1, tb), lambda i: (i, 0, 0)),
        ),
        compiler_params=pltpu.CompilerParams(
            dimension_semantics=("parallel",),
            vmem_limit_bytes=vmem_limit,
        ),
    )(state, w1, b1, w2, b2, w3, b3)

    return out_slab.reshape(num_blocks * tb)[:B].reshape(B, 1)


def init_params(key, obs_dim, hidden, weight_dtype=jnp.bfloat16):
    """Deterministic synthetic init (PyTorch-Linear-style uniform fan-in bounds).

    w1/w2 are stored in `weight_dtype` (bf16 default: native MXU dtype, half the
    DMA bytes); biases and the width-1 head weight stay f32 (VPU path).
    """
    ks = jax.random.split(key, 6)

    def uni(k, shape, fan_in, dtype=jnp.float32):
        bound = 1.0 / jnp.sqrt(jnp.float32(fan_in))
        return jax.random.uniform(k, shape, jnp.float32, -bound, bound).astype(dtype)

    return {
        "w1": uni(ks[0], (obs_dim, hidden), obs_dim, weight_dtype),
        "b1": uni(ks[1], (1, hidden), obs_dim),
        "w2": uni(ks[2], (hidden, hidden), hidden, weight_dtype),
        "b2": uni(ks[3], (1, hidden), hidden),
        "w3": uni(ks[4], (1, hidden), hidden),     # row layout for the VPU/XLU head
        "b3": uni(ks[5], (1,), hidden),
    }


def reference_forward(state, p):
    """Pure-JAX reference mirroring the kernel math (same dtypes/accumulation)."""
    h1 = jnp.dot(state.astype(p["w1"].dtype), p["w1"],
                 preferred_element_type=jnp.float32)
    h1 = jnp.maximum(h1 + p["b1"], 0.0)
    h2 = jnp.dot(h1.astype(p["w2"].dtype), p["w2"],
                 preferred_element_type=jnp.float32)
    h2 = jnp.maximum(h2 + p["b2"], 0.0)
    return jnp.sum(h2 * p["w3"], axis=-1, keepdims=True) + p["b3"]


if __name__ == "__main__":
    key = jax.random.PRNGKey(0)
    k_state, k_params, k_state2 = jax.random.split(key, 3)

    obs_dim, hidden = 16, 32
    params = init_params(k_params, obs_dim, hidden)

    # Small shape matching the module (batch=2): single-block path.
    state = jax.random.normal(k_state, (2, obs_dim), jnp.float32)
    q1 = jax.block_until_ready(base_critic_forward(state, params))
    assert q1.shape == (2, 1)
    assert jnp.allclose(q1, reference_forward(state, params), atol=1e-4, rtol=1e-4)

    # Exercise the tiled multi-block path (grid of 4, lane-dense output slab).
    state2 = jax.random.normal(k_state2, (32, obs_dim), jnp.float32)
    q2 = jax.block_until_ready(base_critic_forward(state2, params, block_b=8))
    assert q2.shape == (32, 1)
    assert jnp.allclose(q2, reference_forward(state2, params), atol=1e-4, rtol=1e-4)

    print("KERNEL_OK")
</pallas_src>

<mosaic_0001>
module attributes {stable_mosaic.version = 11 : i64} {
  func.func @_critic_mlp_kernel(%arg0: i32, %arg1: memref<2x16xf32, #tpu.memory_space<vmem>>, %arg2: memref<16x32xbf16, #tpu.memory_space<vmem>>, %arg3: memref<1x32xf32, #tpu.memory_space<vmem>>, %arg4: memref<32x32xbf16, #tpu.memory_space<vmem>>, %arg5: memref<1x32xf32, #tpu.memory_space<vmem>>, %arg6: memref<1x32xf32, #tpu.memory_space<vmem>>, %arg7: memref<1xf32, #tpu.memory_space<smem>>, %arg8: memref<1x1x2xf32, #tpu.memory_space<vmem>>) attributes {dimension_semantics = [#tpu.dimension_semantics<parallel>], iteration_bounds = array<i64: 1>, scalar_prefetch = 0 : i64, scratch_operands = 0 : i64, tpu.core_type = #tpu.core_type<tc>, window_params = [{transform_indices = @transform_0, window_bounds = array<i64: 2, 16>}, {pipeline_mode = #tpu.pipeline_mode<synchronous>, transform_indices = @transform_1, window_bounds = array<i64: 16, 32>}, {pipeline_mode = #tpu.pipeline_mode<synchronous>, transform_indices = @transform_2, window_bounds = array<i64: 1, 32>}, {pipeline_mode = #tpu.pipeline_mode<synchronous>, transform_indices = @transform_3, window_bounds = array<i64: 32, 32>}, {pipeline_mode = #tpu.pipeline_mode<synchronous>, transform_indices = @transform_4, window_bounds = array<i64: 1, 32>}, {pipeline_mode = #tpu.pipeline_mode<synchronous>, transform_indices = @transform_5, window_bounds = array<i64: 1, 32>}, {transform_indices = @transform_6, window_bounds = array<i64: 1>}, {transform_indices = @transform_7, window_bounds = array<i64: 1, 1, 2>}]} {
    %c0 = arith.constant 0 : index
    %c0_0 = arith.constant 0 : index
    %0 = vector.load %arg1[%c0, %c0_0] : memref<2x16xf32, #tpu.memory_space<vmem>>, vector<2x16xf32>
    %1 = arith.truncf %0 : vector<2x16xf32> to vector<2x16xbf16>
    %c0_1 = arith.constant 0 : index
    %c0_2 = arith.constant 0 : index
    %2 = vector.load %arg2[%c0_1, %c0_2] : memref<16x32xbf16, #tpu.memory_space<vmem>>, vector<16x32xbf16>
    %cst = arith.constant dense<0.000000e+00> : vector<2x32xf32>
    %3 = tpu.matmul %1, %2, %cst {dimension_numbers = #tpu.dot_dimension_numbers<[1], [0], [0], [1], [0, 0, 1, 1], [], []>} : vector<2x16xbf16>, vector<16x32xbf16>, vector<2x32xf32> -> vector<2x32xf32>
    %c0_3 = arith.constant 0 : index
    %c0_4 = arith.constant 0 : index
    %4 = vector.load %arg3[%c0_3, %c0_4] : memref<1x32xf32, #tpu.memory_space<vmem>>, vector<1x32xf32>
    %5 = vector.broadcast %4 : vector<1x32xf32> to vector<2x32xf32>
    %6 = arith.addf %3, %5 : vector<2x32xf32>
    %cst_5 = arith.constant 0.000000e+00 : f32
    %7 = vector.broadcast %cst_5 : f32 to vector<2x32xf32>
    %8 = arith.maximumf %6, %7 : vector<2x32xf32>
    %9 = arith.truncf %8 : vector<2x32xf32> to vector<2x32xbf16>
    %c0_6 = arith.constant 0 : index
    %c0_7 = arith.constant 0 : index
    %10 = vector.load %arg4[%c0_6, %c0_7] : memref<32x32xbf16, #tpu.memory_space<vmem>>, vector<32x32xbf16>
    %cst_8 = arith.constant dense<0.000000e+00> : vector<2x32xf32>
    %11 = tpu.matmul %9, %10, %cst_8 {dimension_numbers = #tpu.dot_dimension_numbers<[1], [0], [0], [1], [0, 0, 1, 1], [], []>} : vector<2x32xbf16>, vector<32x32xbf16>, vector<2x32xf32> -> vector<2x32xf32>
    %c0_9 = arith.constant 0 : index
    %c0_10 = arith.constant 0 : index
    %12 = vector.load %arg5[%c0_9, %c0_10] : memref<1x32xf32, #tpu.memory_space<vmem>>, vector<1x32xf32>
    %13 = vector.broadcast %12 : vector<1x32xf32> to vector<2x32xf32>
    %14 = arith.addf %11, %13 : vector<2x32xf32>
    %cst_11 = arith.constant 0.000000e+00 : f32
    %15 = vector.broadcast %cst_11 : f32 to vector<2x32xf32>
    %16 = arith.maximumf %14, %15 : vector<2x32xf32>
    %c0_12 = arith.constant 0 : index
    %c0_13 = arith.constant 0 : index
    %17 = vector.load %arg6[%c0_12, %c0_13] : memref<1x32xf32, #tpu.memory_space<vmem>>, vector<1x32xf32>
    %18 = vector.broadcast %17 : vector<1x32xf32> to vector<2x32xf32>
    %19 = arith.mulf %16, %18 : vector<2x32xf32>
    %cst_14 = arith.constant dense<0.000000e+00> : vector<2xf32>
    %20 = vector.multi_reduction <add>, %19, %cst_14 [1] : vector<2x32xf32> to vector<2xf32>
    %c0_15 = arith.constant 0 : index
    %21 = memref.load %arg7[%c0_15] : memref<1xf32, #tpu.memory_space<smem>>
    %22 = vector.broadcast %21 : f32 to vector<2xf32>
    %23 = arith.addf %20, %22 : vector<2xf32>
    %24 = vector.shape_cast %23 : vector<2xf32> to vector<1x1x2xf32>
    %c0_16 = arith.constant 0 : index
    %c0_17 = arith.constant 0 : index
    %c0_18 = arith.constant 0 : index
    %25 = vector.load %arg8[%c0_16, %c0_17, %c0_18] : memref<1x1x2xf32, #tpu.memory_space<vmem>>, vector<1x1x2xf32>
    tpu.vector_store %arg8[%c0_16, %c0_17, %c0_18], %24 {strides = array<i32>} : memref<1x1x2xf32, #tpu.memory_space<vmem>>, vector<1x1x2xf32>,
    return
  }
  func.func @transform_0(%arg0: i32) -> (i32, i32) {
    %c0_i32 = arith.constant 0 : i32
    %c0_i32_0 = arith.constant 0 : i32
    return %arg0, %c0_i32 : i32, i32
  }
  func.func @transform_1(%arg0: i32) -> (i32, i32) {
    %c0_i32 = arith.constant 0 : i32
    %c0_i32_0 = arith.constant 0 : i32
    %c0_i32_1 = arith.constant 0 : i32
    return %c0_i32, %c0_i32_0 : i32, i32
  }
  func.func @transform_2(%arg0: i32) -> (i32, i32) {
    %c0_i32 = arith.constant 0 : i32
    %c0_i32_0 = arith.constant 0 : i32
    %c0_i32_1 = arith.constant 0 : i32
    return %c0_i32, %c0_i32_0 : i32, i32
  }
  func.func @transform_3(%arg0: i32) -> (i32, i32) {
    %c0_i32 = arith.constant 0 : i32
    %c0_i32_0 = arith.constant 0 : i32
    %c0_i32_1 = arith.constant 0 : i32
    return %c0_i32, %c0_i32_0 : i32, i32
  }
  func.func @transform_4(%arg0: i32) -> (i32, i32) {
    %c0_i32 = arith.constant 0 : i32
    %c0_i32_0 = arith.constant 0 : i32
    %c0_i32_1 = arith.constant 0 : i32
    return %c0_i32, %c0_i32_0 : i32, i32
  }
  func.func @transform_5(%arg0: i32) -> (i32, i32) {
    %c0_i32 = arith.constant 0 : i32
    %c0_i32_0 = arith.constant 0 : i32
    %c0_i32_1 = arith.constant 0 : i32
    return %c0_i32, %c0_i32_0 : i32, i32
  }
  func.func @transform_6(%arg0: i32) -> i32 {
    %c0_i32 = arith.constant 0 : i32
    %c0_i32_0 = arith.constant 0 : i32
    return %c0_i32 : i32
  }
  func.func @transform_7(%arg0: i32) -> (i32, i32, i32) {
    %c0_i32 = arith.constant 0 : i32
    %c0_i32_0 = arith.constant 0 : i32
    %c0_i32_1 = arith.constant 0 : i32
    return %arg0, %c0_i32, %c0_i32_0 : i32, i32, i32
  }
}

</mosaic_0001>

<bundles_post_ra>
// kernel: tpu_custom_call.1
= control target key start
LH: loop header
LB: loop body
LE: loop exit
PB: predicated region body
PF: predicated region fallthrough
CT: control target
= control target key end

     0   :  { %13 = vsyncpa [#allocation4], 0  ;;  %s341_s0 = inlined_call_operand.vmem [shape: f32[2,16], index: 0, kind: input, shape index: {}]   ;;  %s342_s1 = inlined_call_operand.hbm [shape: bf16[16,32], index: 1, kind: input, shape index: {}]   ;;  %s343_s2 = inlined_call_operand.vmem [shape: f32[1,32], index: 2, kind: input, shape index: {}]   ;;  %s344_s3 = inlined_call_operand.hbm [shape: bf16[32,32], index: 3, kind: input, shape index: {}]   ;;  %s345_s4 = inlined_call_operand.vmem [shape: f32[1,32], index: 4, kind: input, shape index: {}]   ;;  %s346_s5 = inlined_call_operand.vmem [shape: f32[1,32], index: 5, kind: input, shape index: {}]   ;;  %s347_s6 = inlined_call_operand.<no memory space> [shape: f32[1], index: 6, kind: input, shape index: {}]   ;;  %s348_s7 = inlined_call_operand.hbm [shape: f32[1,1,2], index: 7, kind: output, shape index: {}]  }
   0x1   :  { %14 = vsyncpa [#allocation7], 0 }
   0x2   :  { %15 = vsyncpa [#allocation5], 0  ;;  %s22_s26 = sshll.u32 %s342_s1, 4  ;;  %s272_s27 = smov [#allocation3]   ;;  %s23_s26 = int_to_ptr.hbm [resolvable:$true] %s22_s26 }
   0x3   :  { %s24_s28 = sshll.u32 %s272_s27, 4  ;;  %s37_s8 = sshll.u32 %s344_s3, 4  ;;  %s25_s28 = int_to_ptr.vmem [resolvable:$true] %s24_s28  ;;  %s38_s8 = int_to_ptr.hbm [resolvable:$true] %s37_s8 }
   0x4   :  { %s273_s9 = smov 64   ;;  %s274_s10 = smov 4  }
   0x5   :  { %30 = dma.hbm_to_vmem [thread:$0]  %s23_s26, 128, %s25_s28, [#allocation4], %s273_s9, %s273_s9, %s274_s10  }
   0x6   :  { %s275_s11 = smov [#allocation6]  }
   0x7   :  { %s39_s12 = sshll.u32 %s275_s11, 4  ;;  %s40_s12 = int_to_ptr.vmem [resolvable:$true] %s39_s12 }
   0x8   :  { %45 = dma.hbm_to_vmem [thread:$0]  %s38_s8, 256, %s40_s12, [#allocation7], %s273_s9, %s273_s9, %s274_s10  }
   0x9   :  { %266 = dma.done.wait [#allocation4], 128  }
   0xa   :  { %267 = vsyncadd [#allocation4], 4294967168 }
   0xb   :  { %268 = dma.done.wait [#allocation7], 256  }
   0xc   :  { %269 = vsyncadd [#allocation7], 4294967040  ;;  %v183_v0 = vld [vmem:[#allocation3] sm:$0xff]  ;;  %vm75_vm0 = vcmask 130048   ;;  %v185_v3 = vld [vmem:[#allocation6 + $0x8] sm:$0xff]  ;;  %vm114_vm1 = vcmask 261120   ;;  %v145_v19 = vlaneseq  ;;  %v142_v20 = vstv %s347_s6 }
   0xd   :  { %v61_v1 = vld [vmem:[%s341_s0] sm:$0x3]  ;;  %86 = vmatpush.bf16.msra.mxu0 %v183_v0  ;;  %124 = vmatpush.bf16.msra.mxu1 %v185_v3  ;;  %v184_v4 = vld [vmem:[#allocation6] sm:$0xff]  ;;  %vm137_vm2 = vcmask 254976   ;;  %s158_s22 = sshll.u32 %s348_s7, 4  ;;  %vm149_vm3 = vcmask 8192   ;;  %s159_s22 = int_to_ptr.hbm [resolvable:$true] %s158_s22 }
   0xe   :  { %v62_v2 = vpack.c.bf16 %v61_v1, %v61_v1  ;;  %v191_v5 = vld [vmem:[%s343_s2] ss:$0 sm:$0xff]  ;;  %v146_v21 = vand.u32 127, %v145_v19 }
   0xf   :  { %v192_v11 = vld [vmem:[%s345_s4] ss:$0 sm:$0xff]  ;;  %s276_s4 = smov [#allocation8]  }
  0x10   :  { %173 = vmatmul.msk.bf16.vlgmr.msra.gmra.mxu0 %vm75_vm0, %v62_v2  ;;  %v193_v14 = vld [vmem:[%s346_s5] ss:$0 sm:$0xff]  ;;  %s156_s19 = sshll.u32 %s276_s4, 4  ;;  %s157_s19 = int_to_ptr.vmem [resolvable:$true] %s156_s19 }
  0x11   :  { %125 = vmatpush.bf16.msra.mxu1 %v184_v4 }
  0x8d   :  { %v88_v6 = vpop.f32.mrf.mxu0 }
  0x8e   :  { %v89_v7 = vadd.f32 %v191_v5, %v88_v6 }
  0x90   :  { %v92_v8 = vmax.f32 %v89_v7, 0.0 }
  0x92   :  { %v93_v9 = vpack.c.bf16 %v92_v8, %v92_v8 }
  0x94   :  { %182 = vmatmul.msk.bf16.vlgmr.msra.gmra.mxu1 %vm114_vm1, %v93_v9 }
  0x95   :  { %v90_v10 = vpop.f32.mrf.mxu0 }
 0x111   :  { %v127_v12 = vpop.f32.mrf.mxu1 }
 0x112   :  { %v128_v13 = vadd.f32 %v192_v11, %v127_v12 }
 0x114   :  { %v131_v15 = vmax.f32 %v128_v13, 0.0 }
 0x116   :  { %v136_v16 = vmul.f32 %v193_v14, %v131_v15 }
 0x118   :  { %v138_v17 = vsel %vm137_vm2, %v136_v16, 0.0 }
 0x119   :  { %v129_v18 = vpop.f32.mrf.mxu1  ;;  %139 = vadd.xlane.f32.xlu0 %v138_v17 }
 0x18c   :  { %v140_v22 = vpop.xlane.xlu0 %139 }
 0x18d   :  { %v143_v23 = vadd.f32 %v142_v20, %v140_v22 }
 0x18f   :  { %v147_v24 = vperm.slane %v143_v23, %v146_v21 }
 0x191   :  { %150 = vst.msk [vmem:[#allocation8] sm:$0x1] %vm149_vm3, %v147_v24 }
 0x192   :  { %161 = dma.vmem_to_hbm [thread:$0]  %s157_s19, 16, %s159_s22, [#allocation5]  }
 0x193   :  { %270 = dma.done.wait [#allocation5], 16  }
 0x194   :  { %271 = vsyncadd [#allocation5], 4294967280 }
 0x195   :  { %166 = vsyncpa [#allocation4], 1 }
 0x196   :  { %167 = vsyncpa [#allocation7], 1 }
 0x197   :  { %168 = vsyncpa [#allocation5], 1 }

</bundles_post_ra>
